<compile_context>
chip_gen: v6e
topology: v6e:2x2x1
jax: 0.10.0
libtpu: 0.0.40
codegen_flags: <defaults>
</compile_context>

<pallas_src>
import functools

import jax
import jax.numpy as jnp
from jax.experimental import pallas as pl
from jax.experimental.pallas import tpu as pltpu

HEAD_PAD = 128         # lane-dense fused head width (adv cols + value col + zero pad)
MIN_SPLIT_BATCH = 256  # below this, a single block wins (per-step overhead dominates)


def _round_up(n, m):
    return (n + m - 1) // m * m


def _qnet_kernel(x_ref, w1_ref, b1_ref, w2_ref, b2_ref, wh_ref, bh_ref, q_ref,
                 *, n_actions):
    # Trunk MLP: Linear -> ReLU -> Linear -> ReLU  (MXU matmuls, f32 accumulation).
    x = x_ref[...]
    h1 = jnp.maximum(
        jnp.dot(x, w1_ref[...], preferred_element_type=jnp.float32) + b1_ref[...], 0.0)
    h2 = jnp.maximum(
        jnp.dot(h1, w2_ref[...], preferred_element_type=jnp.float32) + b2_ref[...], 0.0)

    # Fused dueling head: one lane-dense [hidden, 128] matmul.
    #   head[:, 0:A]   = advantage
    #   head[:, A]     = value
    #   head[:, A+1:]  = 0 (zero-padded weights & bias)
    head = jnp.dot(h2, wh_ref[...], preferred_element_type=jnp.float32) + bh_ref[...]

    value = head[:, n_actions:n_actions + 1]                    # [TB, 1]
    sum_adv = jnp.sum(head, axis=1, keepdims=True) - value      # padded cols are 0
    avg_adv = sum_adv * (1.0 / n_actions)                       # mean over REAL actions

    # Narrow output: only the n_actions Q columns are written back to HBM.
    q_ref[...] = (head[:, :n_actions] + (value - avg_adv)).astype(q_ref.dtype)


def pack_params(params):
    """Pack raw weights once (call when params change, NOT per forward step)."""
    w1, b1 = params["w1"], params["b1"]
    w2, b2 = params["w2"], params["b2"]
    wv, bv = params["wv"], params["bv"]
    wa, ba = params["wa"], params["ba"]
    hidden = w1.shape[1]
    n_actions = wa.shape[1]
    assert n_actions + 1 <= HEAD_PAD, "n_actions too large for fused head padding"

    pad = HEAD_PAD - n_actions - 1
    # Fused head weight [hidden, 128]: cols [0, A) = advantage, col A = value.
    wh = jnp.concatenate(
        [wa.astype(jnp.float32), wv.astype(jnp.float32),
         jnp.zeros((hidden, pad), jnp.float32)], axis=1)
    bh = jnp.concatenate(
        [ba.reshape(-1).astype(jnp.float32), bv.reshape(-1).astype(jnp.float32),
         jnp.zeros((pad,), jnp.float32)]).reshape(1, HEAD_PAD)

    return {
        "w1": w1.astype(jnp.float32), "b1": b1.reshape(1, hidden).astype(jnp.float32),
        "w2": w2.astype(jnp.float32), "b2": b2.reshape(1, hidden).astype(jnp.float32),
        "wh": wh, "bh": bh,
        "n_actions": n_actions,
    }


def qnetwork_forward(x, packed, *, tile_b=1024):
    """x: [B, obs_dim] float32. packed: pack_params(...) output. Returns [B, n_actions]."""
    w1, b1 = packed["w1"], packed["b1"]
    w2, b2 = packed["w2"], packed["b2"]
    wh, bh = packed["wh"], packed["bh"]
    n_actions = packed["n_actions"]
    B, obs_dim = x.shape
    hidden = w1.shape[1]

    # --- batch tiling --------------------------------------------------------
    if B <= MIN_SPLIT_BATCH:
        tb = B                      # single full-batch block: no padding, no grid loop
    else:
        # At least 2 grid steps so the "parallel" batch axis can shard across
        # v7x's two TensorCores; tile capped at tile_b, sublane-aligned (mult of 8).
        n_tiles = max(2, pl.cdiv(B, tile_b))
        tb = min(tile_b, _round_up(pl.cdiv(B, n_tiles), 8))
    b_padded = _round_up(B, tb)
    x_in = x if b_padded == B else jnp.pad(x, ((0, b_padded - B), (0, 0)))
    grid = (b_padded // tb,)

    kernel = functools.partial(_qnet_kernel, n_actions=n_actions)

    q = pl.pallas_call(
        kernel,
        out_shape=jax.ShapeDtypeStruct((b_padded, n_actions), jnp.float32),
        grid_spec=pltpu.PrefetchScalarGridSpec(
            num_scalar_prefetch=0,
            grid=grid,
            in_specs=[
                pl.BlockSpec((tb, obs_dim), lambda i: (i, 0)),        # x: tiled on batch
                pl.BlockSpec((obs_dim, hidden), lambda i: (0, 0)),    # w1: resident
                pl.BlockSpec((1, hidden), lambda i: (0, 0)),          # b1
                pl.BlockSpec((hidden, hidden), lambda i: (0, 0)),     # w2
                pl.BlockSpec((1, hidden), lambda i: (0, 0)),          # b2
                pl.BlockSpec((hidden, HEAD_PAD), lambda i: (0, 0)),   # fused head W
                pl.BlockSpec((1, HEAD_PAD), lambda i: (0, 0)),        # fused head b
            ],
            out_specs=pl.BlockSpec((tb, n_actions), lambda i: (i, 0)),  # narrow q tile
        ),
        compiler_params=pltpu.CompilerParams(
            dimension_semantics=("parallel",),   # batch tiles shard across TCs on v7x
        ),
    )(x_in, w1, b1, w2, b2, wh, bh)

    return q if b_padded == B else q[:B]


# ----------------------------- init & reference ------------------------------

def _orthogonal(key, shape, gain):
    """Deterministic orthogonal init (matches torch.nn.init.orthogonal_ semantics)."""
    rows, cols = shape
    n = max(rows, cols)
    a = jax.random.normal(key, (n, n), dtype=jnp.float32)
    q, r = jnp.linalg.qr(a)
    q = q * jnp.sign(jnp.diag(r))
    return gain * q[:rows, :cols]


def init_params(key, obs_dim, n_actions, hidden=64):
    k1, k2, k3, k4, k5, k6 = jax.random.split(key, 6)
    sqrt2 = float(jnp.sqrt(2.0))
    # Trunk layers: orthogonal(std=sqrt(2)), bias=0  (layer_init in reference).
    w1 = _orthogonal(k1, (obs_dim, hidden), sqrt2)
    w2 = _orthogonal(k2, (hidden, hidden), sqrt2)
    # Heads: default nn.Linear init ~ U(-1/sqrt(fan_in), 1/sqrt(fan_in)).
    bound = 1.0 / float(jnp.sqrt(float(hidden)))
    wv = jax.random.uniform(k3, (hidden, 1), jnp.float32, -bound, bound)
    wa = jax.random.uniform(k4, (hidden, n_actions), jnp.float32, -bound, bound)
    bv = jax.random.uniform(k5, (1,), jnp.float32, -bound, bound)
    ba = jax.random.uniform(k6, (n_actions,), jnp.float32, -bound, bound)
    return {
        "w1": w1, "b1": jnp.zeros((hidden,), jnp.float32),
        "w2": w2, "b2": jnp.zeros((hidden,), jnp.float32),
        "wv": wv, "bv": bv,
        "wa": wa, "ba": ba,
    }


def _reference(x, p):
    h = jnp.maximum(x @ p["w1"] + p["b1"], 0.0)
    h = jnp.maximum(h @ p["w2"] + p["b2"], 0.0)
    v = h @ p["wv"] + p["bv"]
    a = h @ p["wa"] + p["ba"]
    return v + a - jnp.mean(a, axis=1, keepdims=True)


if __name__ == "__main__":
    key = jax.random.PRNGKey(0)
    k_x, k_x2, k_p = jax.random.split(key, 3)

    batch, obs_dim, n_actions = 8, 8, 4
    params = init_params(k_p, obs_dim, n_actions)
    packed = pack_params(params)   # packed once; reused across forward calls

    # Small batch: single full-batch block fast path.
    x = jax.random.normal(k_x, (batch, obs_dim), dtype=jnp.float32)
    q = jax.block_until_ready(qnetwork_forward(x, packed))
    q_ref = _reference(x, params)
    assert q.shape == (batch, n_actions)
    assert jnp.allclose(q, q_ref, atol=1e-4, rtol=1e-4), "mismatch vs reference (small batch)"

    # Larger batch: exercises the >=2-tile pipelined grid path (with row padding).
    big_batch = 600
    x_big = jax.random.normal(k_x2, (big_batch, obs_dim), dtype=jnp.float32)
    q_big = jax.block_until_ready(qnetwork_forward(x_big, packed))
    q_big_ref = _reference(x_big, params)
    assert q_big.shape == (big_batch, n_actions)
    assert jnp.allclose(q_big, q_big_ref, atol=1e-4, rtol=1e-4), "mismatch vs reference (tiled batch)"

    print("KERNEL_OK")
</pallas_src>

<mosaic_0001>
module attributes {stable_mosaic.version = 11 : i64} {
  func.func @_qnet_kernel(%arg0: i32, %arg1: memref<8x8xf32, #tpu.memory_space<vmem>>, %arg2: memref<8x64xf32, #tpu.memory_space<vmem>>, %arg3: memref<1x64xf32, #tpu.memory_space<vmem>>, %arg4: memref<64x64xf32, #tpu.memory_space<vmem>>, %arg5: memref<1x64xf32, #tpu.memory_space<vmem>>, %arg6: memref<64x128xf32, #tpu.memory_space<vmem>>, %arg7: memref<1x128xf32, #tpu.memory_space<vmem>>, %arg8: memref<8x4xf32, #tpu.memory_space<vmem>>) attributes {dimension_semantics = [#tpu.dimension_semantics<parallel>], iteration_bounds = array<i64: 1>, scalar_prefetch = 0 : i64, scratch_operands = 0 : i64, tpu.core_type = #tpu.core_type<tc>, window_params = [{transform_indices = @transform_0, window_bounds = array<i64: 8, 8>}, {pipeline_mode = #tpu.pipeline_mode<synchronous>, transform_indices = @transform_1, window_bounds = array<i64: 8, 64>}, {pipeline_mode = #tpu.pipeline_mode<synchronous>, transform_indices = @transform_2, window_bounds = array<i64: 1, 64>}, {pipeline_mode = #tpu.pipeline_mode<synchronous>, transform_indices = @transform_3, window_bounds = array<i64: 64, 64>}, {pipeline_mode = #tpu.pipeline_mode<synchronous>, transform_indices = @transform_4, window_bounds = array<i64: 1, 64>}, {pipeline_mode = #tpu.pipeline_mode<synchronous>, transform_indices = @transform_5, window_bounds = array<i64: 64, 128>}, {pipeline_mode = #tpu.pipeline_mode<synchronous>, transform_indices = @transform_6, window_bounds = array<i64: 1, 128>}, {transform_indices = @transform_7, window_bounds = array<i64: 8, 4>}]} {
    %c0 = arith.constant 0 : index
    %c0_0 = arith.constant 0 : index
    %0 = vector.load %arg1[%c0, %c0_0] : memref<8x8xf32, #tpu.memory_space<vmem>>, vector<8x8xf32>
    %c0_1 = arith.constant 0 : index
    %c0_2 = arith.constant 0 : index
    %1 = vector.load %arg2[%c0_1, %c0_2] : memref<8x64xf32, #tpu.memory_space<vmem>>, vector<8x64xf32>
    %cst = arith.constant dense<0.000000e+00> : vector<8x64xf32>
    %2 = tpu.matmul %0, %1, %cst {dimension_numbers = #tpu.dot_dimension_numbers<[1], [0], [0], [1], [0, 0, 1, 1], [], []>} : vector<8x8xf32>, vector<8x64xf32>, vector<8x64xf32> -> vector<8x64xf32>
    %c0_3 = arith.constant 0 : index
    %c0_4 = arith.constant 0 : index
    %3 = vector.load %arg3[%c0_3, %c0_4] : memref<1x64xf32, #tpu.memory_space<vmem>>, vector<1x64xf32>
    %4 = vector.broadcast %3 : vector<1x64xf32> to vector<8x64xf32>
    %5 = arith.addf %2, %4 : vector<8x64xf32>
    %cst_5 = arith.constant 0.000000e+00 : f32
    %6 = vector.broadcast %cst_5 : f32 to vector<8x64xf32>
    %7 = arith.maximumf %5, %6 : vector<8x64xf32>
    %c0_6 = arith.constant 0 : index
    %c0_7 = arith.constant 0 : index
    %8 = vector.load %arg4[%c0_6, %c0_7] : memref<64x64xf32, #tpu.memory_space<vmem>>, vector<64x64xf32>
    %cst_8 = arith.constant dense<0.000000e+00> : vector<8x64xf32>
    %9 = tpu.matmul %7, %8, %cst_8 {dimension_numbers = #tpu.dot_dimension_numbers<[1], [0], [0], [1], [0, 0, 1, 1], [], []>} : vector<8x64xf32>, vector<64x64xf32>, vector<8x64xf32> -> vector<8x64xf32>
    %c0_9 = arith.constant 0 : index
    %c0_10 = arith.constant 0 : index
    %10 = vector.load %arg5[%c0_9, %c0_10] : memref<1x64xf32, #tpu.memory_space<vmem>>, vector<1x64xf32>
    %11 = vector.broadcast %10 : vector<1x64xf32> to vector<8x64xf32>
    %12 = arith.addf %9, %11 : vector<8x64xf32>
    %cst_11 = arith.constant 0.000000e+00 : f32
    %13 = vector.broadcast %cst_11 : f32 to vector<8x64xf32>
    %14 = arith.maximumf %12, %13 : vector<8x64xf32>
    %c0_12 = arith.constant 0 : index
    %c0_13 = arith.constant 0 : index
    %15 = vector.load %arg6[%c0_12, %c0_13] : memref<64x128xf32, #tpu.memory_space<vmem>>, vector<64x128xf32>
    %cst_14 = arith.constant dense<0.000000e+00> : vector<8x128xf32>
    %16 = tpu.matmul %14, %15, %cst_14 {dimension_numbers = #tpu.dot_dimension_numbers<[1], [0], [0], [1], [0, 0, 1, 1], [], []>} : vector<8x64xf32>, vector<64x128xf32>, vector<8x128xf32> -> vector<8x128xf32>
    %c0_15 = arith.constant 0 : index
    %c0_16 = arith.constant 0 : index
    %17 = vector.load %arg7[%c0_15, %c0_16] : memref<1x128xf32, #tpu.memory_space<vmem>>, vector<1x128xf32>
    %18 = vector.broadcast %17 : vector<1x128xf32> to vector<8x128xf32>
    %19 = arith.addf %16, %18 : vector<8x128xf32>
    %20 = vector.extract_strided_slice %19 {offsets = [0, 4], sizes = [8, 1], strides = [1, 1]} : vector<8x128xf32> to vector<8x1xf32>
    %cst_17 = arith.constant dense<0.000000e+00> : vector<8xf32>
    %21 = vector.multi_reduction <add>, %19, %cst_17 [1] : vector<8x128xf32> to vector<8xf32>
    %22 = vector.shape_cast %21 : vector<8xf32> to vector<8x1xf32>
    %23 = arith.subf %22, %20 : vector<8x1xf32>
    %cst_18 = arith.constant 2.500000e-01 : f32
    %24 = vector.broadcast %cst_18 : f32 to vector<8x1xf32>
    %25 = arith.mulf %23, %24 : vector<8x1xf32>
    %26 = vector.extract_strided_slice %19 {offsets = [0, 0], sizes = [8, 4], strides = [1, 1]} : vector<8x128xf32> to vector<8x4xf32>
    %27 = arith.subf %20, %25 : vector<8x1xf32>
    %28 = vector.broadcast %27 : vector<8x1xf32> to vector<8x4xf32>
    %29 = arith.addf %26, %28 : vector<8x4xf32>
    %c0_19 = arith.constant 0 : index
    %c0_20 = arith.constant 0 : index
    %30 = vector.load %arg8[%c0_19, %c0_20] : memref<8x4xf32, #tpu.memory_space<vmem>>, vector<8x4xf32>
    tpu.vector_store %arg8[%c0_19, %c0_20], %29 {strides = array<i32>} : memref<8x4xf32, #tpu.memory_space<vmem>>, vector<8x4xf32>,
    return
  }
  func.func @transform_0(%arg0: i32) -> (i32, i32) {
    %c0_i32 = arith.constant 0 : i32
    %c0_i32_0 = arith.constant 0 : i32
    return %arg0, %c0_i32 : i32, i32
  }
  func.func @transform_1(%arg0: i32) -> (i32, i32) {
    %c0_i32 = arith.constant 0 : i32
    %c0_i32_0 = arith.constant 0 : i32
    %c0_i32_1 = arith.constant 0 : i32
    return %c0_i32, %c0_i32_0 : i32, i32
  }
  func.func @transform_2(%arg0: i32) -> (i32, i32) {
    %c0_i32 = arith.constant 0 : i32
    %c0_i32_0 = arith.constant 0 : i32
    %c0_i32_1 = arith.constant 0 : i32
    return %c0_i32, %c0_i32_0 : i32, i32
  }
  func.func @transform_3(%arg0: i32) -> (i32, i32) {
    %c0_i32 = arith.constant 0 : i32
    %c0_i32_0 = arith.constant 0 : i32
    %c0_i32_1 = arith.constant 0 : i32
    return %c0_i32, %c0_i32_0 : i32, i32
  }
  func.func @transform_4(%arg0: i32) -> (i32, i32) {
    %c0_i32 = arith.constant 0 : i32
    %c0_i32_0 = arith.constant 0 : i32
    %c0_i32_1 = arith.constant 0 : i32
    return %c0_i32, %c0_i32_0 : i32, i32
  }
  func.func @transform_5(%arg0: i32) -> (i32, i32) {
    %c0_i32 = arith.constant 0 : i32
    %c0_i32_0 = arith.constant 0 : i32
    %c0_i32_1 = arith.constant 0 : i32
    return %c0_i32, %c0_i32_0 : i32, i32
  }
  func.func @transform_6(%arg0: i32) -> (i32, i32) {
    %c0_i32 = arith.constant 0 : i32
    %c0_i32_0 = arith.constant 0 : i32
    %c0_i32_1 = arith.constant 0 : i32
    return %c0_i32, %c0_i32_0 : i32, i32
  }
  func.func @transform_7(%arg0: i32) -> (i32, i32) {
    %c0_i32 = arith.constant 0 : i32
    %c0_i32_0 = arith.constant 0 : i32
    return %arg0, %c0_i32 : i32, i32
  }
}

</mosaic_0001>

<bundles_post_ra>
// kernel: tpu_custom_call.1
= control target key start
LH: loop header
LB: loop body
LE: loop exit
PB: predicated region body
PF: predicated region fallthrough
CT: control target
= control target key end

     0   :  { %12 = vsyncpa [#allocation3], 0  ;;  %s602_s0 = inlined_call_operand.hbm [shape: f32[8,8], index: 0, kind: input, shape index: {}]   ;;  %s603_s1 = inlined_call_operand.hbm [shape: f32[8,64], index: 1, kind: input, shape index: {}]   ;;  %s604_s2 = inlined_call_operand.vmem [shape: f32[1,64], index: 2, kind: input, shape index: {}]   ;;  %s605_s3 = inlined_call_operand.hbm [shape: f32[64,64], index: 3, kind: input, shape index: {}]   ;;  %s606_s4 = inlined_call_operand.vmem [shape: f32[1,64], index: 4, kind: input, shape index: {}]   ;;  %s607_s5 = inlined_call_operand.hbm [shape: f32[64,128], index: 5, kind: input, shape index: {}]   ;;  %s608_s6 = inlined_call_operand.vmem [shape: f32[1,128], index: 6, kind: input, shape index: {}]   ;;  %s609_s7 = inlined_call_operand.vmem [shape: f32[8,4], index: 7, kind: output, shape index: {}]  }
   0x1   :  { %13 = vsyncpa [#allocation5], 0 }
   0x2   :  { %14 = vsyncpa [#allocation8], 0  ;;  %s524_s24 = smov [#allocation4]   ;;  %s525_s26 = smov [#allocation2]  }
   0x3   :  { %s31_s25 = sshll.u32 %s524_s24, 4  ;;  %s21_s27 = sshll.u32 %s525_s26, 4  ;;  %s32_s25 = int_to_ptr.vmem [resolvable:$true] %s31_s25  ;;  %s22_s27 = int_to_ptr.vmem [resolvable:$true] %s21_s27 }
   0x4   :  { %s446_s28 = scalar_lea.vmem %s32_s25, 128  ;;  %p451_p1 = scmp.lt.s32.totalorder %s32_s25, %s32_s25 }
   0x5   :  { %p447_p0 = scmp.ne.s32.totalorder %s32_s25, %s446_s28  ;;  %p452_p2 = scmp.lt.s32.totalorder %s446_s28, %s446_s28 }
   0x7   :  { %p453_p3 = por %p452_p2, %p451_p1 }
   0x9   :  { %p454_p4 = pnand %p453_p3, %p447_p0 }
   0xb   :  { %457 = shalt.err (!%p454_p4)
}
   0xc   :  { %34 = dma.hbm_to_vmem [thread:$0]  %s603_s1, 128, %s32_s25, [#allocation5]  }
   0xd   :  { %s466_s8 = scalar_lea.vmem %s22_s27, 128  ;;  %p471_p6 = scmp.lt.s32.totalorder %s22_s27, %s22_s27 }
   0xe   :  { %p467_p5 = scmp.ne.s32.totalorder %s22_s27, %s466_s8  ;;  %p472_p7 = scmp.lt.s32.totalorder %s466_s8, %s466_s8 }
  0x10   :  { %p473_p8 = por %p472_p7, %p471_p6 }
  0x12   :  { %p474_p9 = pnand %p473_p8, %p467_p5 }
  0x14   :  { %477 = shalt.err (!%p474_p9)
}
  0x15   :  { %24 = dma.hbm_to_vmem [thread:$0]  %s602_s0, 128, %s22_s27, [#allocation3]  }
  0x16   :  { %s526_s11 = smov [#allocation6]  }
  0x17   :  { %s42_s12 = sshll.u32 %s526_s11, 4  ;;  %s43_s12 = int_to_ptr.vmem [resolvable:$true] %s42_s12 }
  0x18   :  { %s486_s13 = scalar_lea.vmem %s43_s12, 1024  ;;  %p491_p11 = scmp.lt.s32.totalorder %s43_s12, %s43_s12 }
  0x19   :  { %p487_p10 = scmp.ne.s32.totalorder %s43_s12, %s486_s13  ;;  %p492_p12 = scmp.lt.s32.totalorder %s486_s13, %s486_s13 }
  0x1b   :  { %p493_p13 = por %p492_p12, %p491_p11 }
  0x1d   :  { %p494_p0 = pnand %p493_p13, %p487_p10 }
  0x1f   :  { %497 = shalt.err (!%p494_p0)
}
  0x20   :  { %s527_s1 = smov 128   ;;  %s528_s14 = smov 8  }
  0x21   :  { %48 = dma.hbm_to_vmem [thread:$0]  %s605_s3, 1024, %s43_s12, [#allocation5], %s527_s1, %s527_s1, %s528_s14  }
  0x22   :  { %s529_s17 = smov [#allocation7]  }
  0x23   :  { %s56_s18 = sshll.u32 %s529_s17, 4  ;;  %s57_s18 = int_to_ptr.vmem [resolvable:$true] %s56_s18 }
  0x24   :  { %s506_s0 = scalar_lea.vmem %s57_s18, 1024  ;;  %p511_p2 = scmp.lt.s32.totalorder %s57_s18, %s57_s18 }
  0x25   :  { %p507_p1 = scmp.ne.s32.totalorder %s57_s18, %s506_s0  ;;  %p512_p3 = scmp.lt.s32.totalorder %s506_s0, %s506_s0 }
  0x27   :  { %p513_p4 = por %p512_p3, %p511_p2 }
  0x29   :  { %p514_p5 = pnand %p513_p4, %p507_p1 }
  0x2b   :  { %517 = shalt.err (!%p514_p5)
}
  0x2c   :  { %62 = dma.hbm_to_vmem [thread:$0]  %s607_s5, 1024, %s57_s18, [#allocation8], %s527_s1, %s527_s1, %s528_s14  }
  0x2d   :  { %518 = dma.done.wait [#allocation3], 128  }
  0x2e   :  { %519 = vsyncadd [#allocation3], 4294967168 }
  0x2f   :  { %520 = dma.done.wait [#allocation5], 1152  }
  0x30   :  { %521 = vsyncadd [#allocation5], 4294966144 }
  0x31   :  { %522 = dma.done.wait [#allocation8], 1024  }
  0x32   :  { %523 = vsyncadd [#allocation8], 4294966272  ;;  %v530_v0 = vmov 0.0   ;;  %vm531_vm0 = vmmov 0   ;;  %vm86_vm1 = vcmask 64512   ;;  %v78_v1 = vld [vmem:[#allocation4] sm:$0xff] }
  0x33   :  { %385 = vmatprep.subr.mxu0 %v530_v0  ;;  %387 = vmatprep.mubr.msk.f32.mxu0 %vm531_vm0, %v530_v0  ;;  %v77_v2 = vld [vmem:[#allocation2] sm:$0xff]  ;;  %v168_v3 = vld [vmem:[#allocation6 + $0x38] sm:$0xff]  ;;  %v166_v5 = vld [vmem:[#allocation6 + $0x28] sm:$0xff]  ;;  %vm176_vm2 = vcmask 523264   ;;  %v532_v33 = vmov 4   ;;  %vm350_vm3 = vcmask 31744  }
  0x34   :  { %390 = vmatprep.subr.mxu1 %v530_v0  ;;  %406 = vmatprep.mubr.msk.f32.mxu1 %vm531_vm0, %v530_v0  ;;  %v167_v4 = vld [vmem:[#allocation6 + $0x30] sm:$0xff]  ;;  %v165_v6 = vld [vmem:[#allocation6 + $0x20] sm:$0xff]  ;;  %v164_v7 = vld [vmem:[#allocation6 + $0x18] sm:$0xff] }
  0x35   :  { %386 = vmatpush3.msra.mxu0 %v78_v1  ;;  %391 = vmatpush3.msra.mxu1 %v168_v3  ;;  %v163_v8 = vld [vmem:[#allocation6 + $0x10] sm:$0xff]  ;;  %v162_v9 = vld [vmem:[#allocation6 + $0x8] sm:$0xff]  ;;  %v161_v10 = vld [vmem:[#allocation6] sm:$0xff] }
  0x36   :  { %388 = vmatmul.mubr.msk.f32.vlgmr.msra.gmra.mxu0 %vm86_vm1, %v77_v2  ;;  %392 = vmatprep.subr.mxu1 %v530_v0  ;;  %v258_v11 = vld [vmem:[#allocation7 + $0x38] sm:$0xff]  ;;  %v257_v12 = vld [vmem:[#allocation7 + $0x30] sm:$0xff]  ;;  %v256_v13 = vld [vmem:[#allocation7 + $0x28] sm:$0xff] }
  0x37   :  { %393 = vmatpush3.msra.mxu1 %v167_v4  ;;  %409 = vmatprep.subr.mxu0 %v530_v0  ;;  %v255_v14 = vld [vmem:[#allocation7 + $0x20] sm:$0xff]  ;;  %v254_v15 = vld [vmem:[#allocation7 + $0x18] sm:$0xff]  ;;  %v359_v16 = vld [vmem:[%s604_s2] ss:$0 sm:$0xff] }
  0x38   :  { %394 = vmatprep.subr.mxu1 %v530_v0  ;;  %425 = vmatprep.mubr.msk.f32.mxu0 %vm531_vm0, %v530_v0  ;;  %v253_v21 = vld [vmem:[#allocation7 + $0x10] sm:$0xff]  ;;  %v252_v22 = vld [vmem:[#allocation7 + $0x8] sm:$0xff]  ;;  %v251_v23 = vld [vmem:[#allocation7] sm:$0xff] }
  0x39   :  { %395 = vmatpush3.msra.mxu1 %v166_v5  ;;  %410 = vmatpush3.msra.mxu0 %v258_v11  ;;  %v361_v24 = vld [vmem:[%s606_s4] ss:$0 sm:$0xff] }
  0x3a   :  { %396 = vmatprep.subr.mxu1 %v530_v0  ;;  %411 = vmatprep.subr.mxu0 %v530_v0  ;;  %v363_v29 = vld [vmem:[%s608_s6] ss:$0 sm:$0xff] }
  0x3b   :  { %397 = vmatpush3.msra.mxu1 %v165_v6  ;;  %412 = vmatpush3.msra.mxu0 %v257_v12 }
  0x3c   :  { %398 = vmatprep.subr.mxu1 %v530_v0  ;;  %413 = vmatprep.subr.mxu0 %v530_v0 }
  0x3d   :  { %399 = vmatpush3.msra.mxu1 %v164_v7  ;;  %414 = vmatpush3.msra.mxu0 %v256_v13 }
  0x3e   :  { %400 = vmatprep.subr.mxu1 %v530_v0  ;;  %415 = vmatprep.subr.mxu0 %v530_v0 }
  0x3f   :  { %401 = vmatpush3.msra.mxu1 %v163_v8  ;;  %416 = vmatpush3.msra.mxu0 %v255_v14 }
  0x40   :  { %402 = vmatprep.subr.mxu1 %v530_v0  ;;  %417 = vmatprep.subr.mxu0 %v530_v0 }
  0x41   :  { %403 = vmatpush3.msra.mxu1 %v162_v9  ;;  %418 = vmatpush3.msra.mxu0 %v254_v15 }
  0x42   :  { %404 = vmatprep.subr.mxu1 %v530_v0  ;;  %419 = vmatprep.subr.mxu0 %v530_v0 }
  0x43   :  { %405 = vmatpush3.msra.mxu1 %v161_v10  ;;  %420 = vmatpush3.msra.mxu0 %v253_v21 }
  0x44   :  { %421 = vmatprep.subr.mxu0 %v530_v0  ;;  %437 = vset.pattern.permute.xlu0 %v532_v33 }
  0x45   :  { %422 = vmatpush3.msra.mxu0 %v252_v22 }
  0x46   :  { %423 = vmatprep.subr.mxu0 %v530_v0 }
  0x47   :  { %424 = vmatpush3.msra.mxu0 %v251_v23 }
  0xf6   :  { %v156_v17 = vpop.f32.mrf.mxu0 }
  0xf7   :  { %v157_v18 = vadd.f32 %v359_v16, %v156_v17 }
  0xf8   :  { %v389_v19 = vpop.f32.mrf.mxu0 }
  0xf9   :  { %v160_v20 = vmax.f32 %v157_v18, 0.0 }
  0xfb   :  { %407 = vmatmul.mubr.msk.f32.vlgmr.msra.gmra.mxu1 %vm176_vm2, %v160_v20 }
 0x1bb   :  { %v246_v25 = vpop.f32.mrf.mxu1 }
 0x1bc   :  { %v247_v26 = vadd.f32 %v361_v24, %v246_v25 }
 0x1bd   :  { %v408_v27 = vpop.f32.mrf.mxu1 }
 0x1be   :  { %v250_v28 = vmax.f32 %v247_v26, 0.0 }
 0x1c0   :  { %426 = vmatmul.mubr.msk.f32.vlgmr.msra.gmra.mxu0 %vm176_vm2, %v250_v28 }
 0x280   :  { %v335_v30 = vpop.f32.mrf.mxu0 }
 0x281   :  { %v336_v31 = vadd.f32 %v363_v29, %v335_v30 }
 0x282   :  { %v427_v32 = vpop.f32.mrf.mxu0 }
 0x283   :  { %339 = vadd.xlane.f32.xlu0 %v336_v31 }
 0x30c   :  { %v340_v34 = vpop.xlane.xlu0 %339 }
 0x30d   :  { %v341_v35 = vsub.f32 %v340_v34, %v336_v31 }
 0x30f   :  { %v342_v36 = vmul.f32 0.25, %v341_v35 }
 0x311   :  { %v343_v37 = vsub.f32 %v336_v31, %v342_v36 }
 0x313   :  { %346 = vperm.xlu0 %437, %v343_v37  }
 0x38e   :  { %v347_v38 = vpop.permute.xlu0 %346 }
 0x38f   :  { %v349_v39 = vadd.f32 %v347_v38, %v336_v31 }
 0x391   :  { %351 = vst.msk [vmem:[%s609_s7] sm:$0xff] %vm350_vm3, %v349_v39 }
 0x392   :  { %356 = vsyncpa [#allocation3], 1 }
 0x393   :  { %357 = vsyncpa [#allocation5], 1 }
 0x394   :  { %358 = vsyncpa [#allocation8], 1 }

</bundles_post_ra>
